<compile_context>
chip_gen: v6e
topology: v6e:2x2x1
jax: 0.10.0
libtpu: 0.0.40
codegen_flags: <defaults>
</compile_context>

<pallas_src>
import functools

import jax
import jax.numpy as jnp
from jax.experimental import pallas as pl
from jax.experimental.pallas import tpu as pltpu

# Small, TPU-friendly demo stand-ins for the original sizes
# (original: NUM_SAMPLES = 9993, HIDDEN = NUM_SAMPLES + 1000, NUM_CLASS = 13)
NUM_CLASS = 13
NUM_SAMPLES = 128
HIDDEN = NUM_SAMPLES + 128
BATCH = 2
TILE_H = 128  # streamed column-tile width (must be a multiple of 128)


def _round_up(n: int, m: int) -> int:
    return ((n + m - 1) // m) * m


def _default_vmem_limit() -> int:
    """Generation-aware VMEM budget (leaves headroom under physical VMEM)."""
    try:
        cap = pltpu.get_tpu_info().vmem_capacity_bytes
    except Exception:
        cap = 128 * 1024 * 1024
    return int(min(cap * 3 // 4, 100 * 1024 * 1024))


def fused_classifier_kernel(x_ref, w_ref, b_ref, w3_ref, b3_ref, out_ref,
                            h1_sc, h2_sc, *, tile_h, num_class):
    """Fused MLP: relu(xW1+b1) -> relu(.W2+b2) -> masked log_softmax(.W3+b3).

    Grid: (phase, column-tile).  phase 0 streams W1 tiles and fills the
    resident bf16 h1 scratch; phase 1 streams W2 tiles into h2; the last grid
    step applies the small resident W3 and a lane-masked log-softmax.
    """
    phase = pl.program_id(0)   # 0: fc1 column tiles, 1: fc2 (+ fc3 at the end)
    j = pl.program_id(1)       # column-tile index within the phase
    nj = pl.num_programs(1)
    col = pl.multiple_of(j * tile_h, tile_h)

    @pl.when(phase == 0)
    def _fc1():
        acc = jnp.dot(x_ref[...], w_ref[...],
                      preferred_element_type=jnp.float32)
        h1_sc[:, pl.ds(col, tile_h)] = jnp.maximum(
            acc + b_ref[...], 0.0).astype(h1_sc.dtype)

    @pl.when(phase == 1)
    def _fc2():
        acc = jnp.dot(h1_sc[...], w_ref[...],
                      preferred_element_type=jnp.float32)
        h2_sc[:, pl.ds(col, tile_h)] = jnp.maximum(
            acc + b_ref[...], 0.0).astype(h2_sc.dtype)

    # NOTE: the last h2 column tile is written and the whole h2 scratch read
    # within the same grid step; program order on the same ref makes this safe.
    @pl.when((phase == 1) & (j == nj - 1))
    def _fc3_logsoftmax():
        logits = jnp.dot(h2_sc[...], w3_ref[...],
                         preferred_element_type=jnp.float32) + b3_ref[...]
        # Mask the lane-padding classes so they cannot corrupt the log-sum-exp.
        class_idx = jax.lax.broadcasted_iota(jnp.int32, logits.shape, 1)
        logits = jnp.where(class_idx < num_class, logits, -jnp.inf)
        m = jnp.max(logits, axis=1, keepdims=True)
        shifted = logits - m
        lse = jnp.log(jnp.sum(jnp.exp(shifted), axis=1, keepdims=True))
        out_ref[...] = shifted - lse


def prepare_params(params, *, tile_h=TILE_H):
    """One-time weight padding / bf16 casting / stacking (hoisted out of the
    forward).  Returns ((w12, b12, w3p, b3p), num_class)."""
    w1, b1, w2, b2, w3, b3 = params
    ns, h = w1.shape
    c = w3.shape[1]
    # Shared padded feature/hidden width: W1 is row-padded to hp so it can be
    # stacked with W2 into a single streamed tensor (zero padding is exact).
    hp = _round_up(max(ns, h), max(tile_h, 128))
    cp = _round_up(c, 128)     # lane-dense output block (no vst.msk tail)

    cast = lambda a: a.astype(jnp.bfloat16)
    w12 = jnp.zeros((2, hp, hp), jnp.bfloat16)
    w12 = w12.at[0, :ns, :h].set(cast(w1))
    w12 = w12.at[1, :h, :h].set(cast(w2))
    b12 = jnp.zeros((2, 1, hp), jnp.float32)
    b12 = b12.at[0, :, :h].set(b1)
    b12 = b12.at[1, :, :h].set(b2)
    w3p = jnp.zeros((hp, cp), jnp.bfloat16).at[:h, :c].set(cast(w3))
    b3p = jnp.zeros((1, cp), jnp.float32).at[:, :c].set(b3)
    prepared = tuple(jax.block_until_ready(a) for a in (w12, b12, w3p, b3p))
    return prepared, c


@functools.partial(jax.jit, static_argnames=("num_class", "tile_h"))
def classifier_forward(x, prepared, *, num_class, tile_h=TILE_H):
    w12, b12, w3p, b3p = prepared
    b, ns = x.shape
    hp = w12.shape[1]
    cp = w3p.shape[1]
    assert hp % tile_h == 0

    bp = _round_up(b, 16)      # bf16 sublane packing (16 rows / vreg)
    # x padded to hp columns to match the row-padded W1 (zero pad -> exact).
    xp = jnp.zeros((bp, hp), jnp.bfloat16).at[:b, :ns].set(
        x.astype(jnp.bfloat16))

    nj = hp // tile_h
    kernel = functools.partial(fused_classifier_kernel, tile_h=tile_h,
                               num_class=num_class)

    out_padded = pl.pallas_call(
        kernel,
        out_shape=jax.ShapeDtypeStruct((bp, cp), jnp.float32),
        grid_spec=pltpu.PrefetchScalarGridSpec(
            num_scalar_prefetch=0,
            grid=(2, nj),
            in_specs=[
                # x: small, resident across the whole grid (constant index ->
                # DMA'd once; pl.Buffered(1) would reclaim its 2nd buffer).
                pl.BlockSpec((bp, hp), lambda p, j: (0, 0)),
                # Stacked W1/W2: the ONLY streamed weight tensor.  Phase picks
                # the layer, j streams lane-dense column tiles.
                pl.BlockSpec((None, hp, tile_h), lambda p, j: (p, 0, j)),
                # Stacked b1/b2 column tiles.
                pl.BlockSpec((None, 1, tile_h), lambda p, j: (p, 0, j)),
                # W3 / b3: tiny, DMA'd once and kept resident.
                pl.BlockSpec((hp, cp), lambda p, j: (0, 0)),
                pl.BlockSpec((1, cp), lambda p, j: (0, 0)),
            ],
            out_specs=pl.BlockSpec((bp, cp), lambda p, j: (0, 0)),
            scratch_shapes=[
                pltpu.VMEM((bp, hp), jnp.bfloat16),   # resident h1 (bf16)
                pltpu.VMEM((bp, hp), jnp.bfloat16),   # resident h2 (bf16)
            ],
        ),
        compiler_params=pltpu.CompilerParams(
            # Phase axis is sequential; the column-tile axis writes shared
            # VMEM scratch (h1/h2), so it must also stay "arbitrary".
            # TODO(synk): with batched M >= 256, add a leading "parallel"
            # batch-tile axis so v7x's second TensorCore shares the work.
            dimension_semantics=("arbitrary", "arbitrary"),
            vmem_limit_bytes=_default_vmem_limit(),
        ),
    )(xp, w12, b12, w3p, b3p)

    return out_padded[:b, :num_class]


def init_params(key):
    """Deterministic init mimicking PyTorch Linear's U(-1/sqrt(fan_in), +)."""
    ks = jax.random.split(key, 6)

    def linear(kw, kb, fan_in, fan_out):
        bound = 1.0 / jnp.sqrt(jnp.float32(fan_in))
        w = jax.random.uniform(kw, (fan_in, fan_out), jnp.float32, -bound, bound)
        b = jax.random.uniform(kb, (1, fan_out), jnp.float32, -bound, bound)
        return w, b

    w1, b1 = linear(ks[0], ks[1], NUM_SAMPLES, HIDDEN)
    w2, b2 = linear(ks[2], ks[3], HIDDEN, HIDDEN)
    w3, b3 = linear(ks[4], ks[5], HIDDEN, NUM_CLASS)
    return (w1, b1, w2, b2, w3, b3)


def reference_forward(x, params):
    """Pure-JAX reference mirroring the kernel's bf16-weight / f32-accum math."""
    w1, b1, w2, b2, w3, b3 = params
    f = lambda a: a.astype(jnp.bfloat16)
    h1 = jnp.maximum(
        jnp.dot(f(x), f(w1), preferred_element_type=jnp.float32) + b1, 0.0)
    h2 = jnp.maximum(
        jnp.dot(f(h1), f(w2), preferred_element_type=jnp.float32) + b2, 0.0)
    logits = jnp.dot(f(h2), f(w3), preferred_element_type=jnp.float32) + b3
    return jax.nn.log_softmax(logits, axis=1)


if __name__ == "__main__":
    key = jax.random.PRNGKey(0)
    k_x, k_p = jax.random.split(key)

    x = jax.random.normal(k_x, (BATCH, NUM_SAMPLES), jnp.float32)
    params = init_params(k_p)

    # One-time weight preparation (padding / casting / stacking), NOT per call.
    prepared, num_class = prepare_params(params, tile_h=TILE_H)

    out = classifier_forward(x, prepared, num_class=num_class, tile_h=TILE_H)
    out = jax.block_until_ready(out)

    ref = reference_forward(x, params)
    assert out.shape == (BATCH, NUM_CLASS)
    assert jnp.allclose(out, ref, atol=2e-2, rtol=2e-2)
    # rows of log_softmax should exponentiate-sum to 1
    assert jnp.allclose(jnp.sum(jnp.exp(out), axis=1), 1.0, atol=1e-3)

    print("KERNEL_OK")
</pallas_src>

<mosaic_0001>
module attributes {stable_mosaic.version = 11 : i64} {
  func.func @fused_classifier_kernel(%arg0: i32, %arg1: i32, %arg2: memref<16x256xbf16, #tpu.memory_space<vmem>>, %arg3: memref<1x256x128xbf16, #tpu.memory_space<vmem>>, %arg4: memref<1x1x128xf32, #tpu.memory_space<vmem>>, %arg5: memref<256x128xbf16, #tpu.memory_space<vmem>>, %arg6: memref<1x128xf32, #tpu.memory_space<vmem>>, %arg7: memref<16x128xf32, #tpu.memory_space<vmem>>, %arg8: memref<16x256xbf16, #tpu.memory_space<vmem>>, %arg9: memref<16x256xbf16, #tpu.memory_space<vmem>>) attributes {dimension_semantics = [#tpu.dimension_semantics<arbitrary>, #tpu.dimension_semantics<arbitrary>], iteration_bounds = array<i64: 2, 2>, scalar_prefetch = 0 : i64, scratch_operands = 2 : i64, tpu.core_type = #tpu.core_type<tc>, window_params = [{pipeline_mode = #tpu.pipeline_mode<synchronous>, transform_indices = @transform_0, window_bounds = array<i64: 16, 256>}, {transform_indices = @transform_1, window_bounds = array<i64: 1, 256, 128>}, {transform_indices = @transform_2, window_bounds = array<i64: 1, 1, 128>}, {pipeline_mode = #tpu.pipeline_mode<synchronous>, transform_indices = @transform_3, window_bounds = array<i64: 256, 128>}, {pipeline_mode = #tpu.pipeline_mode<synchronous>, transform_indices = @transform_4, window_bounds = array<i64: 1, 128>}, {pipeline_mode = #tpu.pipeline_mode<synchronous>, transform_indices = @transform_5, window_bounds = array<i64: 16, 128>}]} {
    %c128_i32 = arith.constant 128 : i32
    %0 = arith.muli %arg1, %c128_i32 : i32
    %1 = tpu.assume_multiple %0, 128 : i32
    %c0_i32 = arith.constant 0 : i32
    %2 = arith.cmpi eq, %arg0, %c0_i32 : i32
    %3 = arith.extui %2 : i1 to i32
    %c0_i32_0 = arith.constant 0 : i32
    %4 = arith.cmpi ne, %3, %c0_i32_0 : i32
    scf.if %4 {
      %c0 = arith.constant 0 : index
      %c0_5 = arith.constant 0 : index
      %13 = vector.load %arg2[%c0, %c0_5] : memref<16x256xbf16, #tpu.memory_space<vmem>>, vector<16x256xbf16>
      %c0_6 = arith.constant 0 : index
      %c0_7 = arith.constant 0 : index
      %c0_8 = arith.constant 0 : index
      %14 = vector.load %arg3[%c0_6, %c0_7, %c0_8] : memref<1x256x128xbf16, #tpu.memory_space<vmem>>, vector<1x256x128xbf16>
      %15 = vector.shape_cast %14 : vector<1x256x128xbf16> to vector<256x128xbf16>
      %cst = arith.constant dense<0.000000e+00> : vector<16x128xf32>
      %16 = tpu.matmul %13, %15, %cst {dimension_numbers = #tpu.dot_dimension_numbers<[1], [0], [0], [1], [0, 0, 1, 1], [], []>} : vector<16x256xbf16>, vector<256x128xbf16>, vector<16x128xf32> -> vector<16x128xf32>
      %c0_9 = arith.constant 0 : index
      %c0_10 = arith.constant 0 : index
      %c0_11 = arith.constant 0 : index
      %17 = vector.load %arg4[%c0_9, %c0_10, %c0_11] : memref<1x1x128xf32, #tpu.memory_space<vmem>>, vector<1x1x128xf32>
      %18 = vector.shape_cast %17 : vector<1x1x128xf32> to vector<1x128xf32>
      %19 = vector.broadcast %18 : vector<1x128xf32> to vector<16x128xf32>
      %20 = arith.addf %16, %19 : vector<16x128xf32>
      %cst_12 = arith.constant 0.000000e+00 : f32
      %21 = vector.broadcast %cst_12 : f32 to vector<16x128xf32>
      %22 = arith.maximumf %20, %21 : vector<16x128xf32>
      %23 = arith.truncf %22 : vector<16x128xf32> to vector<16x128xbf16>
      %c0_13 = arith.constant 0 : index
      %24 = arith.index_cast %1 : i32 to index
      %25 = vector.load %arg8[%c0_13, %24] : memref<16x256xbf16, #tpu.memory_space<vmem>>, vector<16x128xbf16>
      tpu.vector_store %arg8[%c0_13, %24], %23 {strides = array<i32>} : memref<16x256xbf16, #tpu.memory_space<vmem>>, vector<16x128xbf16>,
    } else {
    }
    %c1_i32 = arith.constant 1 : i32
    %5 = arith.cmpi eq, %arg0, %c1_i32 : i32
    %6 = arith.extui %5 : i1 to i32
    %c0_i32_1 = arith.constant 0 : i32
    %7 = arith.cmpi ne, %6, %c0_i32_1 : i32
    scf.if %7 {
      %c0 = arith.constant 0 : index
      %c0_5 = arith.constant 0 : index
      %13 = vector.load %arg8[%c0, %c0_5] : memref<16x256xbf16, #tpu.memory_space<vmem>>, vector<16x256xbf16>
      %c0_6 = arith.constant 0 : index
      %c0_7 = arith.constant 0 : index
      %c0_8 = arith.constant 0 : index
      %14 = vector.load %arg3[%c0_6, %c0_7, %c0_8] : memref<1x256x128xbf16, #tpu.memory_space<vmem>>, vector<1x256x128xbf16>
      %15 = vector.shape_cast %14 : vector<1x256x128xbf16> to vector<256x128xbf16>
      %cst = arith.constant dense<0.000000e+00> : vector<16x128xf32>
      %16 = tpu.matmul %13, %15, %cst {dimension_numbers = #tpu.dot_dimension_numbers<[1], [0], [0], [1], [0, 0, 1, 1], [], []>} : vector<16x256xbf16>, vector<256x128xbf16>, vector<16x128xf32> -> vector<16x128xf32>
      %c0_9 = arith.constant 0 : index
      %c0_10 = arith.constant 0 : index
      %c0_11 = arith.constant 0 : index
      %17 = vector.load %arg4[%c0_9, %c0_10, %c0_11] : memref<1x1x128xf32, #tpu.memory_space<vmem>>, vector<1x1x128xf32>
      %18 = vector.shape_cast %17 : vector<1x1x128xf32> to vector<1x128xf32>
      %19 = vector.broadcast %18 : vector<1x128xf32> to vector<16x128xf32>
      %20 = arith.addf %16, %19 : vector<16x128xf32>
      %cst_12 = arith.constant 0.000000e+00 : f32
      %21 = vector.broadcast %cst_12 : f32 to vector<16x128xf32>
      %22 = arith.maximumf %20, %21 : vector<16x128xf32>
      %23 = arith.truncf %22 : vector<16x128xf32> to vector<16x128xbf16>
      %c0_13 = arith.constant 0 : index
      %24 = arith.index_cast %1 : i32 to index
      %25 = vector.load %arg9[%c0_13, %24] : memref<16x256xbf16, #tpu.memory_space<vmem>>, vector<16x128xbf16>
      tpu.vector_store %arg9[%c0_13, %24], %23 {strides = array<i32>} : memref<16x256xbf16, #tpu.memory_space<vmem>>, vector<16x128xbf16>,
    } else {
    }
    %c1_i32_2 = arith.constant 1 : i32
    %8 = arith.cmpi eq, %arg0, %c1_i32_2 : i32
    %c1_i32_3 = arith.constant 1 : i32
    %9 = arith.cmpi eq, %arg1, %c1_i32_3 : i32
    %10 = arith.andi %8, %9 : i1
    %11 = arith.extui %10 : i1 to i32
    %c0_i32_4 = arith.constant 0 : i32
    %12 = arith.cmpi ne, %11, %c0_i32_4 : i32
    scf.if %12 {
      %c0 = arith.constant 0 : index
      %c0_5 = arith.constant 0 : index
      %13 = vector.load %arg9[%c0, %c0_5] : memref<16x256xbf16, #tpu.memory_space<vmem>>, vector<16x256xbf16>
      %c0_6 = arith.constant 0 : index
      %c0_7 = arith.constant 0 : index
      %14 = vector.load %arg5[%c0_6, %c0_7] : memref<256x128xbf16, #tpu.memory_space<vmem>>, vector<256x128xbf16>
      %cst = arith.constant dense<0.000000e+00> : vector<16x128xf32>
      %15 = tpu.matmul %13, %14, %cst {dimension_numbers = #tpu.dot_dimension_numbers<[1], [0], [0], [1], [0, 0, 1, 1], [], []>} : vector<16x256xbf16>, vector<256x128xbf16>, vector<16x128xf32> -> vector<16x128xf32>
      %c0_8 = arith.constant 0 : index
      %c0_9 = arith.constant 0 : index
      %16 = vector.load %arg6[%c0_8, %c0_9] : memref<1x128xf32, #tpu.memory_space<vmem>>, vector<1x128xf32>
      %17 = vector.broadcast %16 : vector<1x128xf32> to vector<16x128xf32>
      %18 = arith.addf %15, %17 : vector<16x128xf32>
      %19 = tpu.iota {dimensions = array<i32: 1>} : vector<16x128xi32>
      %c13_i32 = arith.constant 13 : i32
      %20 = vector.broadcast %c13_i32 : i32 to vector<16x128xi32>
      %21 = arith.cmpi slt, %19, %20 : vector<16x128xi32>
      %cst_10 = arith.constant 0xFF800000 : f32
      %22 = vector.broadcast %cst_10 : f32 to vector<16x128xf32>
      %23 = arith.select %21, %18, %22 : vector<16x128xi1>, vector<16x128xf32>
      %cst_11 = arith.constant dense<0xFF800000> : vector<16xf32>
      %24 = vector.multi_reduction <maximumf>, %23, %cst_11 [1] : vector<16x128xf32> to vector<16xf32>
      %25 = vector.shape_cast %24 : vector<16xf32> to vector<16x1xf32>
      %26 = vector.broadcast %25 : vector<16x1xf32> to vector<16x128xf32>
      %27 = arith.subf %23, %26 : vector<16x128xf32>
      %28 = math.exp %27 : vector<16x128xf32>
      %cst_12 = arith.constant dense<0.000000e+00> : vector<16xf32>
      %29 = vector.multi_reduction <add>, %28, %cst_12 [1] : vector<16x128xf32> to vector<16xf32>
      %30 = vector.shape_cast %29 : vector<16xf32> to vector<16x1xf32>
      %31 = math.log %30 : vector<16x1xf32>
      %32 = vector.broadcast %31 : vector<16x1xf32> to vector<16x128xf32>
      %33 = arith.subf %27, %32 : vector<16x128xf32>
      %c0_13 = arith.constant 0 : index
      %c0_14 = arith.constant 0 : index
      %34 = vector.load %arg7[%c0_13, %c0_14] : memref<16x128xf32, #tpu.memory_space<vmem>>, vector<16x128xf32>
      tpu.vector_store %arg7[%c0_13, %c0_14], %33 {strides = array<i32>} : memref<16x128xf32, #tpu.memory_space<vmem>>, vector<16x128xf32>,
    } else {
    }
    return
  }
  func.func @transform_0(%arg0: i32, %arg1: i32) -> (i32, i32) {
    %c0_i32 = arith.constant 0 : i32
    %c0_i32_0 = arith.constant 0 : i32
    %c0_i32_1 = arith.constant 0 : i32
    return %c0_i32, %c0_i32_0 : i32, i32
  }
  func.func @transform_1(%arg0: i32, %arg1: i32) -> (i32, i32, i32) {
    %c0_i32 = arith.constant 0 : i32
    %c0_i32_0 = arith.constant 0 : i32
    return %arg0, %c0_i32, %arg1 : i32, i32, i32
  }
  func.func @transform_2(%arg0: i32, %arg1: i32) -> (i32, i32, i32) {
    %c0_i32 = arith.constant 0 : i32
    %c0_i32_0 = arith.constant 0 : i32
    return %arg0, %c0_i32, %arg1 : i32, i32, i32
  }
  func.func @transform_3(%arg0: i32, %arg1: i32) -> (i32, i32) {
    %c0_i32 = arith.constant 0 : i32
    %c0_i32_0 = arith.constant 0 : i32
    %c0_i32_1 = arith.constant 0 : i32
    return %c0_i32, %c0_i32_0 : i32, i32
  }
  func.func @transform_4(%arg0: i32, %arg1: i32) -> (i32, i32) {
    %c0_i32 = arith.constant 0 : i32
    %c0_i32_0 = arith.constant 0 : i32
    %c0_i32_1 = arith.constant 0 : i32
    return %c0_i32, %c0_i32_0 : i32, i32
  }
  func.func @transform_5(%arg0: i32, %arg1: i32) -> (i32, i32) {
    %c0_i32 = arith.constant 0 : i32
    %c0_i32_0 = arith.constant 0 : i32
    %c0_i32_1 = arith.constant 0 : i32
    return %c0_i32, %c0_i32_0 : i32, i32
  }
}

</mosaic_0001>

<bundles_post_ra>
// kernel: classifier_forward.1
= control target key start
LH: loop header
LB: loop body
LE: loop exit
PB: predicated region body
PF: predicated region fallthrough
CT: control target
= control target key end

     0   :  { %s1686_s0 = inlined_call_operand.vmem [shape: bf16[16,256], index: 0, kind: input, shape index: {}]   ;;  %s1687_s1 = inlined_call_operand.hbm [shape: bf16[2,256,256], index: 1, kind: input, shape index: {}]   ;;  %s1688_s2 = inlined_call_operand.vmem [shape: f32[2,1,256], index: 2, kind: input, shape index: {}]   ;;  %s1689_s3 = inlined_call_operand.hbm [shape: bf16[256,128], index: 3, kind: input, shape index: {}]   ;;  %s1690_s4 = inlined_call_operand.vmem [shape: f32[1,128], index: 4, kind: input, shape index: {}]   ;;  %s1691_s5 = inlined_call_operand.vmem [shape: f32[16,128], index: 5, kind: output, shape index: {}]  }
   0x1   :  { %1698 = sst [smem:[#allocation12_spill]] %s1689_s3 }
   0x2   :  { %10 = vsyncpa [#allocation5], 0 }
   0x3   :  { %12 = vsyncpa [#allocation5 + $0x1], 0 }
   0x4   :  { %13 = vsyncpa [#allocation7], 0  ;;  %s1468_s18 = smov 0   ;;  %s1470_s19 = smov 0  }
   0x5   :  { %s1472_s20 = smov 0   ;;  %s1474_s21 = smov 0  }
   0x6   :  { %s1476_s22 = smov 0   ;;  %s1478_s23 = smov 0  }
   0x7   :  { %s1480_s24 = smov 0   ;;  %s1482_s25 = smov 0  }
   0x8 LB: > { %1699 = sst [smem:[#allocation10_spill]] %s1431_s25  ;;  %s1008_s26 = sadd.s32 4294967295, %s1431_s25   ;;  %s1431_s25 = sphi %s1482_s25, %s19_s25   ;;  %s1427_s24 = sphi %s1480_s24, %s1720_s24   ;;  %s1423_s23 = sphi %s1478_s23, %s1719_s23   ;;  %s1419_s22 = sphi %s1476_s22, %s1718_s22   ;;  %s1415_s21 = sphi %s1474_s21, %s1717_s21   ;;  %s1411_s20 = sphi %s1472_s20, %s1716_s20   ;;  %s1407_s19 = sphi %s1470_s19, %s1715_s19   ;;  %s1403_s18 = sphi %s1468_s18, %s1714_s18  }
   0x9   : > { %p68_p0 = scmp.ne.s32.totalorder %s1411_s20, %s1407_s19  ;;  %p69_p1 = scmp.eq.s32.totalorder %s1431_s25, 0 }
   0xa   : > { %p74_p2 = scmp.ne.s32.totalorder %s1407_s19, %s1403_s18  ;;  %p1512_p3 = scmp.eq.s32.totalorder %s1008_s26, 0 }
   0xb   : > { %p70_p4 = por %p69_p1, %p68_p0  ;;  %p1009_p5 = scmp.ge.s32.totalorder %s1431_s25, 1 }
   0xc   : > { %p1519_p6 = por %p1512_p3, %p74_p2  ;;  %p176_p7 = scmp.lt.s32.totalorder %s1431_s25, 5 }
   0xd   : > { %s1433_s6 = smov [#allocation6]   ;;  %p1172_p10 = scmp.lt.s32.totalorder %s1431_s25, 4 }
   0xe   : > { %s1701_s29 = scalar_select %p1519_p6, 1, 0 }
   0xf   : > { %p1524_p8 = pnand %p1009_p5, %p176_p7  ;;  %s191_s7 = sshll.u32 %s1433_s6, 4  ;;  %s192_s7 = int_to_ptr.vmem [resolvable:$true] %s191_s7 }
  0x10   : > { %p1537_p12 = pnand %p1172_p10, %p70_p4  ;;  %s1318_s10 = scalar_lea.vmem %s192_s7, 2048 }
  0x11   : > { %s1702_s30 = scalar_select %p1524_p8, 1, 0 }
  0x12   : > { %p1163_p9 = pneg %p1524_p8  ;;  %p1319_p0 = scmp.ne.s32.totalorder %s192_s7, %s1318_s10 }
  0x13   : > { %p1326_p5 = scmp.lt.s32.totalorder %s192_s7, %s192_s7  ;;  %p1327_p7 = scmp.lt.s32.totalorder %s1318_s10, %s1318_s10 }
  0x14   : > { %p1533_p11 = pnand %p1163_p9, %p1512_p3 }
  0x15   : > { %p1328_p6 = por %p1327_p7, %p1326_p5 }
  0x16   : > { %p1309_p13 = pneg %p1533_p11 }
  0x18   : > { %p1321_p1 = pnand %p1319_p0, %p1309_p13 }
  0x1a   : > { %p1322_p2 = pneg %p1321_p1 }
  0x1c   : > { %p1329_p8 = pnand %p1328_p6, %p1322_p2 }
  0x1e   : > { %1332 = shalt.err (!%p1329_p8)
}
  0x1f   : > { %s1694_s11 = smov 64   ;;  %s1695_s12 = smov 4  }
  0x20   : > { %s1705_s3 = sld [smem:[#allocation12_spill]]  ;;  %s28_s15 = sadd.s32 1, %s1423_s23 }
  0x21   : > { %s31_s16 = sadd.s32 1, %s1427_s24  ;;  %p29_p4 = scmp.ge.s32.totalorder %s28_s15, 2 }
  0x22   : > { %s208_s17 = sand.u32 1, %s1411_s20   ;;  %s1013_s6 = sshll.u32 %s1427_s24, 6 }
  0x23   : > { %s1012_s18 = sshll.u32 %s208_s17, 7  ;;  %s1722_s15 = smov (%p29_p4, %s28_s15), 0 }
  0x24   : > { %1706 = sst [smem:[#allocation11_spill]] %s1722_s15  ;;  %s1724_s16 = smov (!%p29_p4, %s31_s16), %s1427_s24 }
  0x25   : > { %s57_s26 = ssub.s32 %s1423_s23, %s1722_s15  ;;  %p33_p6 = scmp.ge.s32.totalorder %s1724_s16, 2 }
  0x26   : > { %1166 = dma.hbm_to_vmem [thread:$0]  (!%p1533_p11), %s1705_s3, 2048, %s192_s7, [#allocation7], %s1694_s11, %s1694_s11, %s1695_s12  }
  0x27   : > { %s217_s8 = sadd.s32 %s1423_s23, %s1013_s6  ;;  %s212_s10 = scalar_lea.vmem [#allocation4], %s1012_s18 }
  0x28   : > { %s220_s27 = sshll.u32 %s212_s10, 4  ;;  %s1726_s16 = smov (%p33_p6, %s1724_s16), 0  ;;  %s221_s27 = int_to_ptr.vmem [resolvable:$true] %s220_s27 }
  0x29   : > { %s1014_s7 = sshll.u32 %s217_s8, 6  ;;  %s56_s13 = ssub.s32 %s1427_s24, %s1726_s16 }
  0x2a   : > { %s219_s12 = scalar_lea.hbm %s1687_s1, %s1014_s7  ;;  %s58_s3 = sor.u32 %s57_s26, %s56_s13 }
  0x2b   : > { %p59_p8 = scmp.eq.s32.totalorder %s58_s3, 0  ;;  %s209_s25 = scalar_lea.sflag [#allocation5], %s208_s17 }
  0x2c   : > { %p1335_p9 = pneg %p1537_p12  ;;  %s1346_s15 = scalar_lea.vmem %s221_s27, 2048 }
  0x2d   : > { %p1347_p10 = scmp.ne.s32.totalorder %s221_s27, %s1346_s15  ;;  %s1436_s18 = smov [#allocation4]  }
  0x2e   : > { %s1351_s6 = sshll.u32 %s1436_s18, 4  ;;  %s1352_s6 = int_to_ptr.vmem [resolvable:$false] %s1351_s6 }
  0x2f   : > { %p1349_p11 = pnand %p1347_p10, %p1335_p9  ;;  %s1353_s10 = scalar_lea.vmem %s1352_s6, 4096 }
  0x30   : > { %p1354_p0 = scmp.lt.s32.totalorder %s221_s27, %s1352_s6  ;;  %p1355_p1 = scmp.lt.s32.totalorder %s1353_s10, %s1346_s15 }
  0x31   : > { %p1350_p13 = pneg %p1349_p11 }
  0x32   : > { %p1356_p2 = por %p1355_p1, %p1354_p0 }
  0x34   : > { %p1357_p5 = pnand %p1356_p2, %p1350_p13 }
  0x36   : > { %1360 = shalt.err (!%p1357_p5)
}
  0x37   : > { %s1437_s11 = smov 128   ;;  %s1707_s26 = smov 4  }
  0x38   : > { %s1708_s17 = smov 64   ;;  %s1709_s8 = sadd.s32 1, %s1411_s20 }
  0x39   : > { %1170 = dma.hbm_to_vmem [thread:$0]  (!%p1537_p12), %s219_s12, 2048, %s221_s27, %s209_s25, %s1437_s11, %s1708_s17, %s1707_s26  }
  0x3a   : > { %s1578_s7 = scalar_select %p59_p8, %s1411_s20, %s1709_s8  }
  0x3b   : > { %p1710_p7 = scmp.ne.s32.totalorder %s1702_s30, 0 }
  0x3c   : > { %s244_s15 = sand.u32 (!%p1710_p7), 1, %s1407_s19   ;;  %p1711_p4 = scmp.ne.s32.totalorder (!%p1710_p7), %s1701_s29, 0 }
  0x3d   : > { %242 = sbr.rel (%p1710_p7) target bundleno = 1126 (0x466), region = 40  ;;  %s1016_s13 = sshll.u32 (!%p1710_p7), %s244_s15, 7 }
  0x3e   : > { %s245_s14 = scalar_lea.sflag (!%p1710_p7), [#allocation5], %s244_s15  ;;  %s1583_s18 = scalar_lea.vmem (!%p1710_p7), [#allocation4], %s1016_s13 }
  0x42   : > { %1394 = dma.done.wait (%p1711_p4), %s245_s14, 2048  }
  0x43   : > { %1396 = vsyncadd (%p1711_p4), %s245_s14, 4294965248 }
  0x44   : > { %1398 = dma.done.wait (%p1512_p3), [#allocation7], 2048  }
  0x45   : > { %1400 = vsyncadd (%p1512_p3), [#allocation7], 4294965248  ;;  %p281_p12 = scmp.lt.s32.totalorder %s1419_s22, 1  ;;  %p283_p6 = scmp.lt.s32.totalorder %s1415_s21, 1 }
  0x46   : > { %s1019_s3 = sshll.u32 %s1415_s21, 7  ;;  %p1020_p8 = scmp.ne.s32.totalorder %s1419_s22, 0 }
  0x47   : > { %s282_s25 = scalar_select %p281_p12, %s1419_s22, 1 }
  0x48   : > { %s284_s27 = scalar_select %p283_p6, %s1415_s21, 1 }
  0x49   : > { %s1018_s30 = sshll.u32 %s282_s25, 1  ;;  %293 = sbr.rel (%p1020_p8) target bundleno = 319 (0x13f), region = 52 }
  0x4a   : > { %s286_s9 = sadd.s32 %s1018_s30, %s284_s27  ;;  %s492_s17 = sshra.s32 (!%p1020_p8), %s1019_s3, 7 }
  0x4b   : > { %s1601_s6 = scalar_lea.vmem %s1688_s2, %s286_s9  ;;  %s1042_s8 = sshll.u32 (!%p1020_p8), %s492_s17, 2 }
  0x4c   : > { %s495_s15 = scalar_lea.vmem (!%p1020_p8), [#allocation2], %s1042_s8 }
  0x4e   : > { %v1242_v0 = vld [vmem:[%s1583_s18 + $0x78] sm:$0xff]   ;;  %v1244_v2 = vld [vmem:[%s1583_s18 + $0x70] sm:$0xff]   ;;  %v1246_v4 = vld [vmem:[%s1583_s18 + $0x68] sm:$0xff]  }
  0x4f   : > { %v1243_v1 = vld [vmem:[%s1583_s18 + $0x38] sm:$0xff]   ;;  %1091 = vmatprep.subr.bf16.mxu0 %v1242_v0  ;;  %v1245_v3 = vld [vmem:[%s1583_s18 + $0x30] sm:$0xff]   ;;  %v1247_v5 = vld [vmem:[%s1583_s18 + $0x28] sm:$0xff]  }
  0x50   : > { %1092 = vmatpush3.bf16.msra.mxu0 %v1243_v1  ;;  %v1248_v6 = vld [vmem:[%s1583_s18 + $0x60] sm:$0xff]   ;;  %v1250_v8 = vld [vmem:[%s1583_s18 + $0x58] sm:$0xff]   ;;  %v1252_v10 = vld [vmem:[%s1583_s18 + $0x50] sm:$0xff]  }
  0x51   : > { %1093 = vmatprep.subr.bf16.mxu0 %v1244_v2  ;;  %v1249_v7 = vld [vmem:[%s1583_s18 + $0x20] sm:$0xff]   ;;  %v1251_v9 = vld [vmem:[%s1583_s18 + $0x18] sm:$0xff]   ;;  %v1253_v12 = vld [vmem:[%s1583_s18 + $0x10] sm:$0xff]  }
  0x52   : > { %v1260_v11 = vld [vmem:[%s1686_s0 + $0x4] ss:$8 sps:$4 sm:$0xff]   ;;  %v1258_v17 = vld [vmem:[%s1686_s0] ss:$8 sps:$4 sm:$0xff]  }
  0x53   : > { %473 = vmatprep.mubr.bf16.mxu0 %v1260_v11  ;;  %v1254_v13 = vld [vmem:[%s1583_s18 + $0x48] sm:$0xff]   ;;  %v1256_v15 = vld [vmem:[%s1583_s18 + $0x40] sm:$0xff]  }
  0x54   : > { %1094 = vmatpush3.bf16.msra.mxu0 %v1245_v3  ;;  %v1255_v14 = vld [vmem:[%s1583_s18 + $0x8] sm:$0xff]   ;;  %v1257_v16 = vld [vmem:[%s1583_s18] sm:$0xff]  }
  0x55   : > { %1095 = vmatprep.subr.bf16.mxu0 %v1246_v4  ;;  %v1021_v19 = vld [vmem:[%s1601_s6] ss:$0 sm:$0xff] }
  0x58   : > { %1096 = vmatpush3.bf16.msra.mxu0 %v1247_v5 }
  0x59   : > { %1097 = vmatprep.subr.bf16.mxu0 %v1248_v6 }
  0x5c   : > { %1098 = vmatpush3.bf16.msra.mxu0 %v1249_v7 }
  0x5d   : > { %1099 = vmatprep.subr.bf16.mxu0 %v1250_v8 }
  0x60   : > { %1100 = vmatpush3.bf16.msra.mxu0 %v1251_v9 }
  0x61   : > { %1101 = vmatprep.subr.bf16.mxu0 %v1252_v10 }
  0x64   : > { %1102 = vmatpush3.bf16.msra.mxu0 %v1253_v12 }
  0x65   : > { %1103 = vmatprep.subr.bf16.mxu0 %v1254_v13 }
  0x68   : > { %1104 = vmatpush3.bf16.msra.mxu0 %v1255_v14 }
  0x69   : > { %1105 = vmatprep.subr.bf16.mxu0 %v1256_v15 }
  0x6c   : > { %1106 = vmatpush3.bf16.msra.mxu0 %v1257_v16 }
  0x6f   : > { %474 = vmatmul.mubr.bf16.vlgmr.msra.gmra.mxu0 %v1258_v17 }
 0x12f   : > { %v1107_v18 = vpop.f32.mrf.mxu0 }
 0x131   : > { %v1108_v20 = vpop.f32.mrf.mxu0 }
 0x132   : > { %v1109_v21 = vadd.f32 %v1108_v20, %v1107_v18 }
 0x133   : > { %v1110_v22 = vpop.f32.mrf.mxu0 }
 0x134   : > { %v476_v23 = vadd.f32 %v1109_v21, %v1021_v19 }
 0x135   : > { %v1111_v24 = vpop.f32.mrf.mxu0 }
 0x136   : > { %v482_v25 = vmax.f32 %v476_v23, 0.0  ;;  %v1112_v26 = vadd.f32 %v1111_v24, %v1110_v22 }
 0x138   : > { %v1087_v27 = vpack.c.bf16 %v482_v25, %v482_v25  ;;  %v479_v28 = vadd.f32 %v1112_v26, %v1021_v19 }
 0x13a   : > { %496 = vst [vmem:[%s495_s15] sm:$0xf] %v1087_v27  ;;  %v483_v29 = vmax.f32 %v479_v28, 0.0 }
 0x13c   : > { %v1088_v30 = vpack.c.bf16 %v483_v29, %v483_v29 }
 0x13e   : > { %497 = vst [vmem:[%s495_s15 + $0x8] sm:$0xf] %v1088_v30 }
 0x13f PF: > { %p498_p3 = scmp.eq.s32.totalorder %s1419_s22, 1  ;;  %p1043_p9 = scmp.ne.s32.totalorder %s1419_s22, 1 }
 0x140   : > { %s700_s13 = sshra.s32 (!%p1043_p9), %s1019_s3, 7 }
 0x141   : > { %501 = sbr.rel (%p1043_p9) target bundleno = 567 (0x237), region = 56  ;;  %s1065_s14 = sshll.u32 (!%p1043_p9), %s700_s13, 2 }
 0x142   : > { %s703_s25 = scalar_lea.vmem (!%p1043_p9), [#allocation3], %s1065_s14 }
 0x146   : > { %v1261_v31 = vld [vmem:[%s1583_s18 + $0x78] sm:$0xff]   ;;  %v1263_v33 = vld [vmem:[%s1583_s18 + $0x70] sm:$0xff]   ;;  %v1265_v35 = vld [vmem:[%s1583_s18 + $0x68] sm:$0xff]  }
 0x147   : > { %v1262_v32 = vld [vmem:[%s1583_s18 + $0x38] sm:$0xff]   ;;  %1113 = vmatprep.subr.bf16.mxu0 %v1261_v31  ;;  %v1264_v34 = vld [vmem:[%s1583_s18 + $0x30] sm:$0xff]   ;;  %v1266_v36 = vld [vmem:[%s1583_s18 + $0x28] sm:$0xff]  }
 0x148   : > { %1114 = vmatpush3.bf16.msra.mxu0 %v1262_v32  ;;  %v1267_v37 = vld [vmem:[%s1583_s18 + $0x60] sm:$0xff]   ;;  %v1269_v39 = vld [vmem:[%s1583_s18 + $0x58] sm:$0xff]   ;;  %v1271_v41 = vld [vmem:[%s1583_s18 + $0x50] sm:$0xff]  }
 0x149   : > { %1115 = vmatprep.subr.bf16.mxu0 %v1263_v33  ;;  %v1268_v38 = vld [vmem:[%s1583_s18 + $0x20] sm:$0xff]   ;;  %v1270_v40 = vld [vmem:[%s1583_s18 + $0x18] sm:$0xff]   ;;  %v1272_v43 = vld [vmem:[%s1583_s18 + $0x10] sm:$0xff]  }
 0x14a   : > { %v1279_v42 = vld [vmem:[#allocation2 + $0x4] ss:$8 sps:$4 sm:$0xff]   ;;  %v1277_v48 = vld [vmem:[#allocation2] ss:$8 sps:$4 sm:$0xff]  }
 0x14b   : > { %681 = vmatprep.mubr.bf16.mxu0 %v1279_v42  ;;  %v1273_v44 = vld [vmem:[%s1583_s18 + $0x48] sm:$0xff]   ;;  %v1275_v46 = vld [vmem:[%s1583_s18 + $0x40] sm:$0xff]  }
 0x14c   : > { %1116 = vmatpush3.bf16.msra.mxu0 %v1264_v34  ;;  %v1274_v45 = vld [vmem:[%s1583_s18 + $0x8] sm:$0xff]   ;;  %v1276_v47 = vld [vmem:[%s1583_s18] sm:$0xff]  }
 0x14d   : > { %1117 = vmatprep.subr.bf16.mxu0 %v1265_v35  ;;  %v1044_v50 = vld [vmem:[%s1601_s6] ss:$0 sm:$0xff] }
 0x150   : > { %1118 = vmatpush3.bf16.msra.mxu0 %v1266_v36 }
 0x151   : > { %1119 = vmatprep.subr.bf16.mxu0 %v1267_v37 }
 0x154   : > { %1120 = vmatpush3.bf16.msra.mxu0 %v1268_v38 }
 0x155   : > { %1121 = vmatprep.subr.bf16.mxu0 %v1269_v39 }
 0x158   : > { %1122 = vmatpush3.bf16.msra.mxu0 %v1270_v40 }
 0x159   : > { %1123 = vmatprep.subr.bf16.mxu0 %v1271_v41 }
 0x15c   : > { %1124 = vmatpush3.bf16.msra.mxu0 %v1272_v43 }
 0x15d   : > { %1125 = vmatprep.subr.bf16.mxu0 %v1273_v44 }
 0x160   : > { %1126 = vmatpush3.bf16.msra.mxu0 %v1274_v45 }
 0x161   : > { %1127 = vmatprep.subr.bf16.mxu0 %v1275_v46 }
 0x164   : > { %1128 = vmatpush3.bf16.msra.mxu0 %v1276_v47 }
 0x167   : > { %682 = vmatmul.mubr.bf16.vlgmr.msra.gmra.mxu0 %v1277_v48 }
 0x227   : > { %v1129_v49 = vpop.f32.mrf.mxu0 }
 0x229   : > { %v1130_v51 = vpop.f32.mrf.mxu0 }
 0x22a   : > { %v1131_v52 = vadd.f32 %v1130_v51, %v1129_v49 }
 0x22b   : > { %v1132_v53 = vpop.f32.mrf.mxu0 }
 0x22c   : > { %v684_v54 = vadd.f32 %v1131_v52, %v1044_v50 }
 0x22d   : > { %v1133_v55 = vpop.f32.mrf.mxu0 }
 0x22e   : > { %v690_v56 = vmax.f32 %v684_v54, 0.0  ;;  %v1134_v57 = vadd.f32 %v1133_v55, %v1132_v53 }
 0x230   : > { %v1089_v58 = vpack.c.bf16 %v690_v56, %v690_v56  ;;  %v687_v59 = vadd.f32 %v1134_v57, %v1044_v50 }
 0x232   : > { %704 = vst [vmem:[%s703_s25] sm:$0xf] %v1089_v58  ;;  %v691_v60 = vmax.f32 %v687_v59, 0.0 }
 0x234   : > { %v1090_v61 = vpack.c.bf16 %v691_v60, %v691_v60 }
 0x236   : > { %705 = vst [vmem:[%s703_s25 + $0x8] sm:$0xf] %v1090_v61 }
 0x237 PF: > { %p706_p10 = scmp.eq.s32.totalorder %s1415_s21, 1 }
 0x239   : > { %p707_p11 = pnand %p706_p10, %p498_p3 }
 0x23b   : > { %710 = sbr.rel (%p707_p11) target bundleno = 1126 (0x466), region = 60 }
 0x240   : > { %v1280_v62 = vld [vmem:[#allocation6 + $0x78] sm:$0xff]   ;;  %v1282_v0 = vld [vmem:[#allocation6 + $0x70] sm:$0xff]   ;;  %v1284_v2 = vld [vmem:[#allocation6 + $0x68] sm:$0xff]   ;;  %v899_v16 = vlaneseq }
 0x241   : > { %v1281_v63 = vld [vmem:[#allocation6 + $0x38] sm:$0xff]   ;;  %1135 = vmatprep.subr.bf16.mxu0 %v1280_v62  ;;  %v1283_v1 = vld [vmem:[#allocation6 + $0x30] sm:$0xff]   ;;  %v1285_v3 = vld [vmem:[#allocation6 + $0x28] sm:$0xff]  }
 0x242   : > { %1136 = vmatpush3.bf16.msra.mxu0 %v1281_v63  ;;  %v1286_v4 = vld [vmem:[#allocation6 + $0x60] sm:$0xff]   ;;  %v1288_v6 = vld [vmem:[#allocation6 + $0x58] sm:$0xff]   ;;  %v1290_v8 = vld [vmem:[#allocation6 + $0x50] sm:$0xff]   ;;  %v900_v18 = vand.u32 127, %v899_v16 }
 0x243   : > { %1137 = vmatprep.subr.bf16.mxu0 %v1282_v0  ;;  %v1287_v5 = vld [vmem:[#allocation6 + $0x20] sm:$0xff]   ;;  %v1289_v7 = vld [vmem:[#allocation6 + $0x18] sm:$0xff]   ;;  %v1291_v10 = vld [vmem:[#allocation6 + $0x10] sm:$0xff]  }
 0x244   : > { %v1298_v9 = vld [vmem:[#allocation3 + $0x4] ss:$8 sps:$4 sm:$0xff]   ;;  %v1292_v11 = vld [vmem:[#allocation6 + $0x48] sm:$0xff]   ;;  %v1294_v13 = vld [vmem:[#allocation6 + $0x40] sm:$0xff]   ;;  %vm901_vm0 = vcmp.lt.s32.totalorder %v900_v18, 13 }
 0x245   : > { %890 = vmatprep.mubr.bf16.mxu0 %v1298_v9  ;;  %v1293_v12 = vld [vmem:[#allocation6 + $0x8] sm:$0xff]   ;;  %v1295_v14 = vld [vmem:[#allocation6] sm:$0xff]   ;;  %v1296_v15 = vld [vmem:[#allocation3] ss:$8 sps:$4 sm:$0xff]  }
 0x246   : > { %1138 = vmatpush3.bf16.msra.mxu0 %v1283_v1  ;;  %v1066_v20 = vld [vmem:[%s1690_s4] ss:$0 sm:$0xff] }
 0x247   : > { %1139 = vmatprep.subr.bf16.mxu0 %v1284_v2 }
 0x24a   : > { %1140 = vmatpush3.bf16.msra.mxu0 %v1285_v3 }
 0x24b   : > { %1141 = vmatprep.subr.bf16.mxu0 %v1286_v4 }
 0x24e   : > { %1142 = vmatpush3.bf16.msra.mxu0 %v1287_v5 }
 0x24f   : > { %1143 = vmatprep.subr.bf16.mxu0 %v1288_v6 }
 0x252   : > { %1144 = vmatpush3.bf16.msra.mxu0 %v1289_v7 }
 0x253   : > { %1145 = vmatprep.subr.bf16.mxu0 %v1290_v8 }
 0x256   : > { %1146 = vmatpush3.bf16.msra.mxu0 %v1291_v10 }
 0x257   : > { %1147 = vmatprep.subr.bf16.mxu0 %v1292_v11 }
 0x25a   : > { %1148 = vmatpush3.bf16.msra.mxu0 %v1293_v12 }
 0x25b   : > { %1149 = vmatprep.subr.bf16.mxu0 %v1294_v13 }
 0x25e   : > { %1150 = vmatpush3.bf16.msra.mxu0 %v1295_v14 }
 0x261   : > { %891 = vmatmul.mubr.bf16.vlgmr.msra.gmra.mxu0 %v1296_v15 }
 0x321   : > { %v1151_v17 = vpop.f32.mrf.mxu0 }
 0x323   : > { %v1152_v19 = vpop.f32.mrf.mxu0 }
 0x324   : > { %v1153_v21 = vadd.f32 %v1152_v19, %v1151_v17 }
 0x325   : > { %v1154_v22 = vpop.f32.mrf.mxu0 }
 0x326   : > { %v893_v23 = vadd.f32 %v1153_v21, %v1066_v20 }
 0x327   : > { %v1155_v24 = vpop.f32.mrf.mxu0 }
 0x328   : > { %v1156_v25 = vadd.f32 %v1155_v24, %v1154_v22  ;;  %v902_v26 = vsel %vm901_vm0, %v893_v23, -inf }
 0x329   : > { %904 = vmax.xlane.f32.xlu0 %v902_v26 }
 0x32a   : > { %v896_v27 = vadd.f32 %v1156_v25, %v1066_v20 }
 0x32c   : > { %v903_v28 = vsel %vm901_vm0, %v896_v27, -inf }
 0x32d   : > { %906 = vmax.xlane.f32.xlu0 %v903_v28 }
 0x3b2   : > { %v905_v29 = vpop.xlane.xlu0 %904 }
 0x3b3   : > { %v908_v30 = vsub.f32 %v902_v26, %v905_v29 }
 0x3b5   : > { %v910_v31 = vmul.f32 1.442695, %v908_v30 }
 0x3b6   : > { %v907_v32 = vpop.xlane.xlu0 %906 }
 0x3b7   : > { %v909_v33 = vsub.f32 %v903_v28, %v907_v32  ;;  %1299 = vpow2.f32 %v910_v31 }
 0x3b9   : > { %v912_v34 = vmul.f32 1.442695, %v909_v33 }
 0x3bb   : > { %1301 = vpow2.f32 %v912_v34 }
 0x3c4   : > { %v1300_v35 = vpop.eup %1299 }
 0x3c5   : > { %914 = vadd.xlane.f32.xlu1 %v1300_v35 }
 0x3c8   : > { %v1302_v36 = vpop.eup %1301 }
 0x3c9   : > { %916 = vadd.xlane.f32.xlu1 %v1302_v36 }
 0x44e   : > { %v915_v37 = vpop.xlane.xlu1 %914 }
 0x44f   : > { %1303 = vlog2.f32 %v915_v37 }
 0x452   : > { %v917_v38 = vpop.xlane.xlu1 %916 }
 0x453   : > { %1305 = vlog2.f32 %v917_v38 }
 0x45c   : > { %v1304_v39 = vpop.eup %1303 }
 0x45d   : > { %v919_v40 = vmul.f32 0.6931472, %v1304_v39 }
 0x45f   : > { %v922_v41 = vsub.f32 %v908_v30, %v919_v40 }
 0x460   : > { %v1306_v42 = vpop.eup %1305 }
 0x461   : > { %924 = vst [vmem:[%s1691_s5] sm:$0xff] %v922_v41  ;;  %v921_v43 = vmul.f32 0.6931472, %v1306_v42 }
 0x463   : > { %v923_v44 = vsub.f32 %v909_v33, %v921_v43 }
 0x465   : > { %925 = vst [vmem:[%s1691_s5 + $0x8] sm:$0xff] %v923_v44 }
 0x466 PF: > { %s1712_s9 = sld [smem:[#allocation10_spill]]  ;;  %s1714_s18 = smov %s1407_s19 }
 0x467   : > { %s1713_s29 = sld [smem:[#allocation11_spill]]  ;;  %s1715_s19 = smov %s1411_s20 }
 0x468   : > { %s1716_s20 = smov %s1578_s7  ;;  %s1717_s21 = smov %s1423_s23 }
 0x469   : > { %s1718_s22 = smov %s1427_s24  ;;  %s1720_s24 = smov %s1726_s16 }
 0x46c   : > { %s19_s25 = sadd.s32 1, %s1712_s9  }
 0x46d   : > { %p16_p13 = scmp.ge.s32.totalorder %s19_s25, 6   ;;  %s1719_s23 = smov %s1713_s29 }
 0x46f   :  { %18 = sbr.rel (!%p16_p13) target bundleno = 8 (0x8), region = 97 }
 0x474   :  { %937 = vsyncpa [#allocation5], 1 }
 0x475   :  { %939 = vsyncpa [#allocation5 + $0x1], 1 }
 0x476   :  { %940 = vsyncpa [#allocation7], 1 }

</bundles_post_ra>
